<compile_context>
chip_gen: v5e
topology: v5e:2x2
jax: 0.10.0
libtpu: 0.0.40
codegen_flags: <defaults>
</compile_context>

<pallas_src>
import jax
import jax.numpy as jnp
from jax.experimental import pallas as pl
from jax.experimental.pallas import tpu as pltpu

# Make the pure-JAX reference and the in-kernel dots both use exact f32 matmul
# so the numerical comparison below is tight.
jax.config.update("jax_default_matmul_precision", "highest")

# --- AutoGAN attention search-space sizes (models_search/controller.py) -----
UP_TYPE = ("bilinear", "nearest", "deconv")        # 3
NORM_TYPE = (None, "bn", "in")                     # 3
ATTENTION_TYPE = (True, False)                     # 2
TOKENS = [len(UP_TYPE), len(NORM_TYPE), len(ATTENTION_TYPE)]   # [3, 3, 2]

HID_SIZE = 32
BATCH = 8          # fills all 8 sublanes of a vreg
LANE = 128
SUBLANE = 8


def _round_up(x, m):
    return (x + m - 1) // m * m


def _batch_tile(bp):
    """Batch-tile size for the 'parallel' grid axis (bp is a multiple of 8)."""
    if bp <= 64:
        return bp
    for t in (64, 32, 16, 8):
        if bp % t == 0:
            return t
    return bp


# ---------------------------------------------------------------------------
# Fused controller kernel: trace-time unrolled n_steps x (LSTMCell -> decoders)
# ---------------------------------------------------------------------------
def _controller_kernel(emb_ref,                    # (n_steps, BT, H) step inputs
                       h0_ref, c0_ref,             # (BT, H)
                       wih_ref, whh_ref, bg_ref,   # (H,4H), (H,4H), (1,4H)  [i|f|o|g]
                       wd_ref, bd_ref,             # (H, T_pad), (1, T_pad)
                       logits_ref,                 # (n_steps, BT, T_pad)
                       hx_ref, cx_ref):            # (BT, H)
    n_steps, _, H = emb_ref.shape

    whh = whh_ref[...]
    wd = wd_ref[...]
    bd = bd_ref[...]

    # Input-side gate pre-activations for every step, computed up front: these
    # dots do not depend on the recurrence, so the scheduler can overlap them
    # with the serial h/c chain (and there is no per-step concatenate).
    wih = wih_ref[...]
    bg = bg_ref[...]
    xg = [jnp.dot(emb_ref[s], wih, preferred_element_type=jnp.float32) + bg
          for s in range(n_steps)]

    h = h0_ref[...]
    c = c0_ref[...]
    for s in range(n_steps):           # trace-time unroll: no grid-step overhead
        gates = xg[s] + jnp.dot(h, whh, preferred_element_type=jnp.float32)
        sig = jax.nn.sigmoid(gates[:, :3 * H])     # [i | f | o] in one EUP pass
        g_g = jnp.tanh(gates[:, 3 * H:])           # [g]
        c = sig[:, H:2 * H] * c + sig[:, :H] * g_g
        h = sig[:, 2 * H:3 * H] * jnp.tanh(c)
        # all decoders at once; lane-dense (BT, 128) store, sliced by caller
        logits_ref[s] = jnp.dot(h, wd, preferred_element_type=jnp.float32) + bd

    hx_ref[...] = h
    cx_ref[...] = c


@jax.jit
def _controller_call(emb, h0, c0, wih, whh, bg, wd, bd):
    n_steps, Bp, H = emb.shape
    t_pad = wd.shape[1]
    bt = _batch_tile(Bp)

    wconst = lambda b: (0, 0)          # VMEM-resident weights, same tile always

    grid_spec = pltpu.PrefetchScalarGridSpec(
        num_scalar_prefetch=0,
        grid=(Bp // bt,),              # independent batch tiles (rollouts)
        in_specs=[
            pl.BlockSpec((n_steps, bt, H), lambda b: (0, b, 0)),  # step inputs
            pl.BlockSpec((bt, H), lambda b: (b, 0)),              # h0
            pl.BlockSpec((bt, H), lambda b: (b, 0)),              # c0
            pl.BlockSpec((H, 4 * H), wconst),                     # W_ih^T [i|f|o|g]
            pl.BlockSpec((H, 4 * H), wconst),                     # W_hh^T [i|f|o|g]
            pl.BlockSpec((1, 4 * H), wconst),                     # b_ih + b_hh
            pl.BlockSpec((H, t_pad), wconst),                     # packed decoder W
            pl.BlockSpec((1, t_pad), wconst),                     # packed decoder b
        ],
        out_specs=(
            pl.BlockSpec((n_steps, bt, t_pad), lambda b: (0, b, 0)),  # logits
            pl.BlockSpec((bt, H), lambda b: (b, 0)),                  # final hx
            pl.BlockSpec((bt, H), lambda b: (b, 0)),                  # final cx
        ),
    )
    return pl.pallas_call(
        _controller_kernel,
        grid_spec=grid_spec,
        out_shape=(
            jax.ShapeDtypeStruct((n_steps, Bp, t_pad), jnp.float32),
            jax.ShapeDtypeStruct((Bp, H), jnp.float32),
            jax.ShapeDtypeStruct((Bp, H), jnp.float32),
        ),
        compiler_params=pltpu.CompilerParams(
            dimension_semantics=("parallel",)),    # batch tiles are independent
    )(emb, h0, c0, wih, whh, bg, wd, bd)


# ---------------------------------------------------------------------------
# Parameters (PyTorch layout) + kernel-layout packing
# ---------------------------------------------------------------------------
def init_params(key, hid_size, tokens):
    """Deterministic parameters with torch.nn layouts."""
    H = hid_size
    k = 1.0 / float(H) ** 0.5
    keys = iter(jax.random.split(key, 4 * 3 + 1 + 2 * len(tokens)))
    lstm = []
    for _ in range(3):                       # lstm1, lstm2, lstm3
        lstm.append(dict(
            w_ih=jax.random.uniform(next(keys), (4 * H, H), jnp.float32, -k, k),
            w_hh=jax.random.uniform(next(keys), (4 * H, H), jnp.float32, -k, k),
            b_ih=jax.random.uniform(next(keys), (4 * H,), jnp.float32, -k, k),
            b_hh=jax.random.uniform(next(keys), (4 * H,), jnp.float32, -k, k)))
    encoder = jax.random.normal(next(keys), (sum(tokens), H), jnp.float32)
    dec = []
    for t in tokens:
        dec.append(dict(
            w=jax.random.uniform(next(keys), (t, H), jnp.float32, -k, k),
            b=jax.random.uniform(next(keys), (t,), jnp.float32, -k, k)))
    return dict(lstm=lstm, encoder=encoder, dec=dec,
                tokens=list(tokens), hid_size=H)


def pack_params(params):
    """Re-layout the PyTorch parameters for the fused kernel."""
    H = params["hid_size"]
    tokens = params["tokens"]
    t_pad = _round_up(sum(tokens), LANE)     # lane-dense packed decoder width

    def reorder_ifog(a):
        # PyTorch gate order [i, f, g, o] -> kernel order [i, f, o, g] so the
        # kernel does ONE sigmoid on lanes [:3H] and ONE tanh on lanes [3H:].
        i, f, g, o = a[..., :H], a[..., H:2 * H], a[..., 2 * H:3 * H], a[..., 3 * H:]
        return jnp.concatenate([i, f, o, g], axis=-1)

    w_ih_t, w_hh_t, b_gates = [], [], []
    for cell in params["lstm"]:
        w_ih_t.append(reorder_ifog(cell["w_ih"].T))                    # (H, 4H)
        w_hh_t.append(reorder_ifog(cell["w_hh"].T))                    # (H, 4H)
        b_gates.append(reorder_ifog((cell["b_ih"] + cell["b_hh"])[None, :]))

    w_dec = jnp.zeros((H, t_pad), jnp.float32)
    b_dec = jnp.zeros((1, t_pad), jnp.float32)
    offsets, off = [], 0
    for d in params["dec"]:
        t = d["w"].shape[0]
        w_dec = w_dec.at[:, off:off + t].set(d["w"].T)
        b_dec = b_dec.at[0, off:off + t].set(d["b"])
        offsets.append(off)
        off += t

    return dict(hid_size=H, tokens=list(tokens), offsets=offsets,
                encoder=params["encoder"],
                w_ih_t=w_ih_t, w_hh_t=w_hh_t, b_gates=b_gates,
                w_dec_packed=w_dec, b_dec_packed=b_dec)


def _pad_rows(a, rows):
    if a.shape[0] == rows:
        return a
    return jnp.pad(a, ((0, rows - a.shape[0]), (0, 0)))


# ---------------------------------------------------------------------------
# forward(x, hidden, index)  ==  ControllerAttn.forward (single step)
# ---------------------------------------------------------------------------
def controller_attn_forward(kp, x, hidden, index):
    """index is a static Python int (it selects nn.Modules in PyTorch)."""
    tokens = kp["tokens"]
    hx, cx = hidden
    B = hx.shape[0]
    Bp = _round_up(B, SUBLANE)

    if index == 0:
        embed = x.astype(jnp.float32)
    else:
        embed = jnp.take(kp["encoder"], x, axis=0)   # tiny XLA gather
    if 0 <= index < 3:          # only lstm1 is reachable (len(decoders) == 3),
        cell = 0                # but keep the module's selection logic anyway
    elif 3 <= index < 7:
        cell = 1
    else:
        cell = 2

    emb = _pad_rows(embed, Bp)[None]                 # (1, Bp, H)
    logits_pad, hx_n, cx_n = _controller_call(
        emb, _pad_rows(hx, Bp), _pad_rows(cx, Bp),
        kp["w_ih_t"][cell], kp["w_hh_t"][cell], kp["b_gates"][cell],
        kp["w_dec_packed"], kp["b_dec_packed"])
    off = kp["offsets"][index]
    logit = logits_pad[0, :B, off:off + tokens[index]]
    return logit, (hx_n[:B], cx_n[:B])


# ---------------------------------------------------------------------------
# Fused multi-step forward (the sample() recurrence, minus the sampling)
# ---------------------------------------------------------------------------
def controller_attn_unroll(kp, x0, hidden, step_token_ids):
    """Runs forward for index = 0..len(tokens)-1 in ONE pallas_call (trace-time
    unrolled).  Step 0 consumes x0 directly; step s>=1 consumes
    encoder(step_token_ids[s]) (row 0 of step_token_ids is ignored)."""
    tokens = kp["tokens"]
    n_steps = len(tokens)
    hx, cx = hidden
    B = hx.shape[0]
    Bp = _round_up(B, SUBLANE)

    # Pre-gather all step inputs (a few KB) so the kernel never builds one-hots.
    steps = [x0.astype(jnp.float32)]
    for s in range(1, n_steps):
        steps.append(jnp.take(kp["encoder"],
                              step_token_ids[s].astype(jnp.int32), axis=0))
    emb = jnp.stack([_pad_rows(e, Bp) for e in steps], axis=0)   # (n_steps,Bp,H)

    logits_pad, hx_n, cx_n = _controller_call(
        emb, _pad_rows(hx, Bp), _pad_rows(cx, Bp),
        kp["w_ih_t"][0], kp["w_hh_t"][0], kp["b_gates"][0],
        kp["w_dec_packed"], kp["b_dec_packed"])
    logits = [logits_pad[s, :B, kp["offsets"][s]:kp["offsets"][s] + tokens[s]]
              for s in range(n_steps)]
    return logits, (hx_n[:B], cx_n[:B])


# ---------------------------------------------------------------------------
# Pure-JAX reference (PyTorch semantics)
# ---------------------------------------------------------------------------
def reference_forward(params, x, hidden, index):
    hx, cx = hidden
    H = params["hid_size"]
    embed = x if index == 0 else jnp.take(params["encoder"], x, axis=0)
    cell = params["lstm"][0 if index < 3 else (1 if index < 7 else 2)]
    gates = (embed @ cell["w_ih"].T + cell["b_ih"]
             + hx @ cell["w_hh"].T + cell["b_hh"])
    i = jax.nn.sigmoid(gates[:, :H])
    f = jax.nn.sigmoid(gates[:, H:2 * H])
    g = jnp.tanh(gates[:, 2 * H:3 * H])
    o = jax.nn.sigmoid(gates[:, 3 * H:])
    c_new = f * cx + i * g
    h_new = o * jnp.tanh(c_new)
    d = params["dec"][index]
    logit = h_new @ d["w"].T + d["b"]
    return logit, (h_new, c_new)


if __name__ == "__main__":
    key = jax.random.PRNGKey(0)
    pkey, xkey, hkey, ikey = jax.random.split(key, 4)
    params = init_params(pkey, HID_SIZE, TOKENS)
    kp = pack_params(params)

    B = BATCH
    h0 = 0.1 * jax.random.normal(hkey, (B, HID_SIZE), jnp.float32)
    c0 = 0.1 * jax.random.normal(jax.random.fold_in(hkey, 1),
                                 (B, HID_SIZE), jnp.float32)
    hidden = (h0, c0)

    def check(a, b, msg):
        assert jnp.allclose(a, b, atol=1e-3, rtol=1e-3), msg

    # ---- single-step forward (exact ControllerAttn.forward), indices 0..2 --
    x0 = jax.random.normal(xkey, (B, HID_SIZE), jnp.float32)
    logit0, hid1 = controller_attn_forward(kp, x0, hidden, 0)
    jax.block_until_ready(logit0)
    r_logit0, r_hid1 = reference_forward(params, x0, hidden, 0)
    check(logit0, r_logit0, "logit idx0")
    check(hid1[0], r_hid1[0], "hx idx0")
    check(hid1[1], r_hid1[1], "cx idx0")

    ids1 = jax.random.randint(ikey, (B,), 0, TOKENS[0], dtype=jnp.int32)
    logit1, hid2 = controller_attn_forward(kp, ids1, hid1, 1)
    r_logit1, r_hid2 = reference_forward(params, ids1, r_hid1, 1)
    check(logit1, r_logit1, "logit idx1")
    check(hid2[0], r_hid2[0], "hx idx1")

    ids2 = TOKENS[0] + jax.random.randint(jax.random.fold_in(ikey, 1),
                                          (B,), 0, TOKENS[1], dtype=jnp.int32)
    logit2, hid3 = controller_attn_forward(kp, ids2, hid2, 2)
    r_logit2, r_hid3 = reference_forward(params, ids2, r_hid2, 2)
    check(logit2, r_logit2, "logit idx2")

    # ---- fused 3-step unroll: ONE pallas_call, zero per-step grid overhead --
    step_ids = jnp.stack([jnp.zeros((B,), jnp.int32), ids1, ids2], axis=0)
    logits_f, hid_f = controller_attn_unroll(kp, x0, hidden, step_ids)
    jax.block_until_ready(hid_f)
    check(logits_f[0], r_logit0, "fused logit step0")
    check(logits_f[1], r_logit1, "fused logit step1")
    check(logits_f[2], r_logit2, "fused logit step2")
    check(hid_f[0], r_hid3[0], "fused final hx")
    check(hid_f[1], r_hid3[1], "fused final cx")

    # ---- 16 stacked independent rollouts: fills MXU rows; 'parallel' batch-
    # ---- tile grid axis (2 tiles of 64 rows) can split across v7x cores -----
    R = 16
    xb = jnp.tile(x0, (R, 1))
    hb = (jnp.tile(h0, (R, 1)), jnp.tile(c0, (R, 1)))
    idsb = jnp.tile(step_ids, (1, R))
    logits_b, hid_b = controller_attn_unroll(kp, xb, hb, idsb)
    jax.block_until_ready(hid_b)
    check(logits_b[0][:B], r_logit0, "batched rollout logit step0")
    check(logits_b[2][:B], r_logit2, "batched rollout logit step2")
    check(hid_b[0][:B], r_hid3[0], "batched rollout final hx")

    print("KERNEL_OK")
</pallas_src>

<mosaic_0001>
module attributes {stable_mosaic.version = 11 : i64} {
  func.func @_controller_kernel(%arg0: i32, %arg1: memref<1x8x32xf32, #tpu.memory_space<vmem>>, %arg2: memref<8x32xf32, #tpu.memory_space<vmem>>, %arg3: memref<8x32xf32, #tpu.memory_space<vmem>>, %arg4: memref<32x128xf32, #tpu.memory_space<vmem>>, %arg5: memref<32x128xf32, #tpu.memory_space<vmem>>, %arg6: memref<1x128xf32, #tpu.memory_space<vmem>>, %arg7: memref<32x128xf32, #tpu.memory_space<vmem>>, %arg8: memref<1x128xf32, #tpu.memory_space<vmem>>, %arg9: memref<1x8x128xf32, #tpu.memory_space<vmem>>, %arg10: memref<8x32xf32, #tpu.memory_space<vmem>>, %arg11: memref<8x32xf32, #tpu.memory_space<vmem>>) attributes {dimension_semantics = [#tpu.dimension_semantics<parallel>], iteration_bounds = array<i64: 1>, scalar_prefetch = 0 : i64, scratch_operands = 0 : i64, tpu.core_type = #tpu.core_type<tc>, window_params = [{transform_indices = @transform_0, window_bounds = array<i64: 1, 8, 32>}, {transform_indices = @transform_1, window_bounds = array<i64: 8, 32>}, {transform_indices = @transform_2, window_bounds = array<i64: 8, 32>}, {pipeline_mode = #tpu.pipeline_mode<synchronous>, transform_indices = @transform_3, window_bounds = array<i64: 32, 128>}, {pipeline_mode = #tpu.pipeline_mode<synchronous>, transform_indices = @transform_4, window_bounds = array<i64: 32, 128>}, {pipeline_mode = #tpu.pipeline_mode<synchronous>, transform_indices = @transform_5, window_bounds = array<i64: 1, 128>}, {pipeline_mode = #tpu.pipeline_mode<synchronous>, transform_indices = @transform_6, window_bounds = array<i64: 32, 128>}, {pipeline_mode = #tpu.pipeline_mode<synchronous>, transform_indices = @transform_7, window_bounds = array<i64: 1, 128>}, {transform_indices = @transform_8, window_bounds = array<i64: 1, 8, 128>}, {transform_indices = @transform_9, window_bounds = array<i64: 8, 32>}, {transform_indices = @transform_10, window_bounds = array<i64: 8, 32>}]} {
    %c0 = arith.constant 0 : index
    %c0_0 = arith.constant 0 : index
    %0 = vector.load %arg5[%c0, %c0_0] : memref<32x128xf32, #tpu.memory_space<vmem>>, vector<32x128xf32>
    %c0_1 = arith.constant 0 : index
    %c0_2 = arith.constant 0 : index
    %1 = vector.load %arg7[%c0_1, %c0_2] : memref<32x128xf32, #tpu.memory_space<vmem>>, vector<32x128xf32>
    %c0_3 = arith.constant 0 : index
    %c0_4 = arith.constant 0 : index
    %2 = vector.load %arg8[%c0_3, %c0_4] : memref<1x128xf32, #tpu.memory_space<vmem>>, vector<1x128xf32>
    %c0_5 = arith.constant 0 : index
    %c0_6 = arith.constant 0 : index
    %3 = vector.load %arg4[%c0_5, %c0_6] : memref<32x128xf32, #tpu.memory_space<vmem>>, vector<32x128xf32>
    %c0_7 = arith.constant 0 : index
    %c0_8 = arith.constant 0 : index
    %4 = vector.load %arg6[%c0_7, %c0_8] : memref<1x128xf32, #tpu.memory_space<vmem>>, vector<1x128xf32>
    %c0_9 = arith.constant 0 : index
    %c0_10 = arith.constant 0 : index
    %c0_11 = arith.constant 0 : index
    %5 = vector.load %arg1[%c0_9, %c0_10, %c0_11] : memref<1x8x32xf32, #tpu.memory_space<vmem>>, vector<1x8x32xf32>
    %6 = vector.shape_cast %5 : vector<1x8x32xf32> to vector<8x32xf32>
    %cst = arith.constant dense<0.000000e+00> : vector<8x128xf32>
    %7 = tpu.matmul %6, %3, %cst {dimension_numbers = #tpu.dot_dimension_numbers<[1], [0], [0], [1], [0, 0, 1, 1], [], []>, precision = #tpu.contract_precision<fp32>} : vector<8x32xf32>, vector<32x128xf32>, vector<8x128xf32> -> vector<8x128xf32>
    %8 = vector.broadcast %4 : vector<1x128xf32> to vector<8x128xf32>
    %9 = arith.addf %7, %8 : vector<8x128xf32>
    %c0_12 = arith.constant 0 : index
    %c0_13 = arith.constant 0 : index
    %10 = vector.load %arg2[%c0_12, %c0_13] : memref<8x32xf32, #tpu.memory_space<vmem>>, vector<8x32xf32>
    %c0_14 = arith.constant 0 : index
    %c0_15 = arith.constant 0 : index
    %11 = vector.load %arg3[%c0_14, %c0_15] : memref<8x32xf32, #tpu.memory_space<vmem>>, vector<8x32xf32>
    %cst_16 = arith.constant dense<0.000000e+00> : vector<8x128xf32>
    %12 = tpu.matmul %10, %0, %cst_16 {dimension_numbers = #tpu.dot_dimension_numbers<[1], [0], [0], [1], [0, 0, 1, 1], [], []>, precision = #tpu.contract_precision<fp32>} : vector<8x32xf32>, vector<32x128xf32>, vector<8x128xf32> -> vector<8x128xf32>
    %13 = arith.addf %9, %12 : vector<8x128xf32>
    %14 = vector.extract_strided_slice %13 {offsets = [0, 0], sizes = [8, 96], strides = [1, 1]} : vector<8x128xf32> to vector<8x96xf32>
    %15 = arith.negf %14 : vector<8x96xf32>
    %16 = math.exp %15 : vector<8x96xf32>
    %cst_17 = arith.constant 1.000000e+00 : f32
    %17 = vector.broadcast %cst_17 : f32 to vector<8x96xf32>
    %18 = arith.addf %17, %16 : vector<8x96xf32>
    %19 = arith.divf %17, %18 : vector<8x96xf32>
    %20 = vector.extract_strided_slice %13 {offsets = [0, 96], sizes = [8, 32], strides = [1, 1]} : vector<8x128xf32> to vector<8x32xf32>
    %21 = math.tanh %20 : vector<8x32xf32>
    %22 = vector.extract_strided_slice %19 {offsets = [0, 32], sizes = [8, 32], strides = [1, 1]} : vector<8x96xf32> to vector<8x32xf32>
    %23 = arith.mulf %22, %11 : vector<8x32xf32>
    %24 = vector.extract_strided_slice %19 {offsets = [0, 0], sizes = [8, 32], strides = [1, 1]} : vector<8x96xf32> to vector<8x32xf32>
    %25 = arith.mulf %24, %21 : vector<8x32xf32>
    %26 = arith.addf %23, %25 : vector<8x32xf32>
    %27 = vector.extract_strided_slice %19 {offsets = [0, 64], sizes = [8, 32], strides = [1, 1]} : vector<8x96xf32> to vector<8x32xf32>
    %28 = math.tanh %26 : vector<8x32xf32>
    %29 = arith.mulf %27, %28 : vector<8x32xf32>
    %cst_18 = arith.constant dense<0.000000e+00> : vector<8x128xf32>
    %30 = tpu.matmul %29, %1, %cst_18 {dimension_numbers = #tpu.dot_dimension_numbers<[1], [0], [0], [1], [0, 0, 1, 1], [], []>, precision = #tpu.contract_precision<fp32>} : vector<8x32xf32>, vector<32x128xf32>, vector<8x128xf32> -> vector<8x128xf32>
    %31 = vector.broadcast %2 : vector<1x128xf32> to vector<8x128xf32>
    %32 = arith.addf %30, %31 : vector<8x128xf32>
    %c0_19 = arith.constant 0 : index
    %c0_20 = arith.constant 0 : index
    %c0_21 = arith.constant 0 : index
    %33 = vector.load %arg9[%c0_19, %c0_20, %c0_21] : memref<1x8x128xf32, #tpu.memory_space<vmem>>, vector<1x8x128xf32>
    %34 = vector.shape_cast %33 : vector<1x8x128xf32> to vector<8x128xf32>
    %35 = vector.shape_cast %32 : vector<8x128xf32> to vector<1x8x128xf32>
    tpu.vector_store %arg9[%c0_19, %c0_20, %c0_21], %35 {strides = array<i32>} : memref<1x8x128xf32, #tpu.memory_space<vmem>>, vector<1x8x128xf32>,
    %c0_22 = arith.constant 0 : index
    %c0_23 = arith.constant 0 : index
    %36 = vector.load %arg10[%c0_22, %c0_23] : memref<8x32xf32, #tpu.memory_space<vmem>>, vector<8x32xf32>
    tpu.vector_store %arg10[%c0_22, %c0_23], %29 {strides = array<i32>} : memref<8x32xf32, #tpu.memory_space<vmem>>, vector<8x32xf32>,
    %c0_24 = arith.constant 0 : index
    %c0_25 = arith.constant 0 : index
    %37 = vector.load %arg11[%c0_24, %c0_25] : memref<8x32xf32, #tpu.memory_space<vmem>>, vector<8x32xf32>
    tpu.vector_store %arg11[%c0_24, %c0_25], %26 {strides = array<i32>} : memref<8x32xf32, #tpu.memory_space<vmem>>, vector<8x32xf32>,
    return
  }
  func.func @transform_0(%arg0: i32) -> (i32, i32, i32) {
    %c0_i32 = arith.constant 0 : i32
    %c0_i32_0 = arith.constant 0 : i32
    %c0_i32_1 = arith.constant 0 : i32
    return %c0_i32, %arg0, %c0_i32_0 : i32, i32, i32
  }
  func.func @transform_1(%arg0: i32) -> (i32, i32) {
    %c0_i32 = arith.constant 0 : i32
    %c0_i32_0 = arith.constant 0 : i32
    return %arg0, %c0_i32 : i32, i32
  }
  func.func @transform_2(%arg0: i32) -> (i32, i32) {
    %c0_i32 = arith.constant 0 : i32
    %c0_i32_0 = arith.constant 0 : i32
    return %arg0, %c0_i32 : i32, i32
  }
  func.func @transform_3(%arg0: i32) -> (i32, i32) {
    %c0_i32 = arith.constant 0 : i32
    %c0_i32_0 = arith.constant 0 : i32
    %c0_i32_1 = arith.constant 0 : i32
    return %c0_i32, %c0_i32_0 : i32, i32
  }
  func.func @transform_4(%arg0: i32) -> (i32, i32) {
    %c0_i32 = arith.constant 0 : i32
    %c0_i32_0 = arith.constant 0 : i32
    %c0_i32_1 = arith.constant 0 : i32
    return %c0_i32, %c0_i32_0 : i32, i32
  }
  func.func @transform_5(%arg0: i32) -> (i32, i32) {
    %c0_i32 = arith.constant 0 : i32
    %c0_i32_0 = arith.constant 0 : i32
    %c0_i32_1 = arith.constant 0 : i32
    return %c0_i32, %c0_i32_0 : i32, i32
  }
  func.func @transform_6(%arg0: i32) -> (i32, i32) {
    %c0_i32 = arith.constant 0 : i32
    %c0_i32_0 = arith.constant 0 : i32
    %c0_i32_1 = arith.constant 0 : i32
    return %c0_i32, %c0_i32_0 : i32, i32
  }
  func.func @transform_7(%arg0: i32) -> (i32, i32) {
    %c0_i32 = arith.constant 0 : i32
    %c0_i32_0 = arith.constant 0 : i32
    %c0_i32_1 = arith.constant 0 : i32
    return %c0_i32, %c0_i32_0 : i32, i32
  }
  func.func @transform_8(%arg0: i32) -> (i32, i32, i32) {
    %c0_i32 = arith.constant 0 : i32
    %c0_i32_0 = arith.constant 0 : i32
    %c0_i32_1 = arith.constant 0 : i32
    return %c0_i32, %arg0, %c0_i32_0 : i32, i32, i32
  }
  func.func @transform_9(%arg0: i32) -> (i32, i32) {
    %c0_i32 = arith.constant 0 : i32
    %c0_i32_0 = arith.constant 0 : i32
    return %arg0, %c0_i32 : i32, i32
  }
  func.func @transform_10(%arg0: i32) -> (i32, i32) {
    %c0_i32 = arith.constant 0 : i32
    %c0_i32_0 = arith.constant 0 : i32
    return %arg0, %c0_i32 : i32, i32
  }
}

</mosaic_0001>

<bundles_post_ra>
// kernel: _controller_call.1
= control target key start
LH: loop header
LB: loop body
LE: loop exit
PB: predicated region body
PF: predicated region fallthrough
CT: control target
= control target key end

     0   :  { %16 = vsyncpa [#allocation3], 0  ;;  %s1258_s0 = inlined_call_operand.hbm [shape: f32[1,8,32], index: 0, kind: input, shape index: {}]   ;;  %s1259_s1 = inlined_call_operand.hbm [shape: f32[8,32], index: 1, kind: input, shape index: {}]   ;;  %s1260_s2 = inlined_call_operand.hbm [shape: f32[8,32], index: 2, kind: input, shape index: {}]   ;;  %s1261_s3 = inlined_call_operand.hbm [shape: f32[32,128], index: 3, kind: input, shape index: {}]   ;;  %s1262_s4 = inlined_call_operand.hbm [shape: f32[32,128], index: 4, kind: input, shape index: {}]   ;;  %s1263_s5 = inlined_call_operand.vmem [shape: f32[1,128], index: 5, kind: input, shape index: {}]   ;;  %s1264_s6 = inlined_call_operand.hbm [shape: f32[32,128], index: 6, kind: input, shape index: {}]   ;;  %s1265_s7 = inlined_call_operand.vmem [shape: f32[1,128], index: 7, kind: input, shape index: {}]   ;;  %s1266_s8 = inlined_call_operand.hbm [shape: f32[1,8,128], index: 8, kind: output, shape index: {0}]   ;;  %s1267_s9 = inlined_call_operand.hbm [shape: f32[8,32], index: 9, kind: output, shape index: {1}]   ;;  %s1268_s10 = inlined_call_operand.hbm [shape: f32[8,32], index: 10, kind: output, shape index: {2}]  }
   0x1   :  { %17 = vsyncpa [#allocation6], 0 }
   0x2   :  { %18 = vsyncpa [#allocation9], 0 }
   0x3   :  { %19 = vsyncpa [#allocation12], 0 }
   0x4   :  { %20 = vsyncpa [#allocation4], 0  ;;  %s38_s15 = sshll.u32 %s1259_s1, 4  ;;  %s39_s15 = int_to_ptr.hbm [resolvable:$true] %s38_s15 }
   0x5   :  { %21 = vsyncpa [#allocation15], 0  ;;  %s1066_s16 = smov [#allocation5]   ;;  %s59_s20 = sshll.u32 %s1261_s3, 4  ;;  %s60_s20 = int_to_ptr.hbm [resolvable:$true] %s59_s20 }
   0x6   :  { %s40_s17 = sshll.u32 %s1066_s16, 4  ;;  %s1067_s21 = smov [#allocation8]   ;;  %s41_s17 = int_to_ptr.vmem [resolvable:$true] %s40_s17 }
   0x7   :  { %43 = dma.hbm_to_vmem [thread:$0]  %s39_s15, 128, %s41_s17, [#allocation6]  }
   0x8   :  { %s61_s22 = sshll.u32 %s1067_s21, 4  ;;  %s1068_s23 = smov 128   ;;  %s62_s22 = int_to_ptr.vmem [resolvable:$true] %s61_s22 }
   0x9   :  { %s1069_s24 = smov 8   ;;  %s27_s1 = sshll.u32 %s1258_s0, 4  ;;  %s28_s1 = int_to_ptr.hbm [resolvable:$true] %s27_s1 }
   0xa   :  { %67 = dma.hbm_to_vmem [thread:$0]  %s60_s20, 512, %s62_s22, [#allocation9], %s1068_s23, %s1068_s23, %s1069_s24  }
   0xb   :  { %s1070_s27 = smov [#allocation2]   ;;  %s49_s3 = sshll.u32 %s1260_s2, 4  ;;  %s50_s3 = int_to_ptr.hbm [resolvable:$true] %s49_s3 }
   0xc   :  { %s29_s28 = sshll.u32 %s1070_s27, 4  ;;  %s1071_s11 = smov [#allocation7]   ;;  %s30_s28 = int_to_ptr.vmem [resolvable:$true] %s29_s28 }
   0xd   :  { %32 = dma.hbm_to_vmem [thread:$0]  %s28_s1, 128, %s30_s28, [#allocation3]  }
   0xe   :  { %s51_s12 = sshll.u32 %s1071_s11, 4  ;;  %s72_s15 = sshll.u32 %s1262_s4, 4  ;;  %s52_s12 = int_to_ptr.vmem [resolvable:$true] %s51_s12  ;;  %s73_s15 = int_to_ptr.hbm [resolvable:$true] %s72_s15 }
   0xf   :  { %54 = dma.hbm_to_vmem [thread:$0]  %s50_s3, 128, %s52_s12, [#allocation6]  }
  0x10   :  { %s87_s17 = sshll.u32 %s1264_s6, 4  ;;  %s1072_s18 = smov [#allocation10]   ;;  %s88_s17 = int_to_ptr.hbm [resolvable:$true] %s87_s17 }
  0x11   :  { %s74_s19 = sshll.u32 %s1072_s18, 4  ;;  %s1073_s2 = smov [#allocation11]   ;;  %s75_s19 = int_to_ptr.vmem [resolvable:$true] %s74_s19 }
  0x12   :  { %80 = dma.hbm_to_vmem [thread:$0]  %s73_s15, 512, %s75_s19, [#allocation9], %s1068_s23, %s1068_s23, %s1069_s24  }
  0x13   :  { %s89_s20 = sshll.u32 %s1073_s2, 4  ;;  %s90_s20 = int_to_ptr.vmem [resolvable:$true] %s89_s20 }
  0x14   :  { %95 = dma.hbm_to_vmem [thread:$0]  %s88_s17, 512, %s90_s20, [#allocation12], %s1068_s23, %s1068_s23, %s1069_s24  }
  0x15   :  { %1054 = dma.done.wait [#allocation3], 128  }
  0x16   :  { %1055 = vsyncadd [#allocation3], 4294967168 }
  0x17   :  { %1056 = dma.done.wait [#allocation6], 256  }
  0x18   :  { %1057 = vsyncadd [#allocation6], 4294967040 }
  0x19   :  { %1058 = dma.done.wait [#allocation9], 1024  }
  0x1a   :  { %1059 = vsyncadd [#allocation9], 4294966272 }
  0x1b   :  { %1060 = dma.done.wait [#allocation12], 512  }
  0x1c   :  { %1061 = vsyncadd [#allocation12], 4294966784  ;;  %vm140_vm0 = vcmask 261120   ;;  %v134_v0 = vld [vmem:[#allocation8 + $0x18] sm:$0xff]  ;;  %v133_v1 = vld [vmem:[#allocation8 + $0x10] sm:$0xff]  ;;  %s1075_s21 = smov 64  }
  0x1d   :  { %v132_v2 = vld [vmem:[#allocation8 + $0x8] sm:$0xff]  ;;  %v1153_v3 = vand.u32 4294901760, %v134_v0  ;;  %v1155_v4 = vand.u32 4294901760, %v133_v1  ;;  %v131_v6 = vld [vmem:[#allocation8] sm:$0xff]  ;;  %v125_v8 = vld [vmem:[#allocation10 + $0x18] sm:$0xff]  ;;  %s1076_s22 = smov 96  }
  0x1e   :  { %v1157_v5 = vand.u32 4294901760, %v132_v2  ;;  %v136_v7 = vld [vmem:[#allocation2] sm:$0xff]  ;;  %v1159_v9 = vand.u32 4294901760, %v131_v6  ;;  %v1162_v11 = vand.u32 4294901760, %v125_v8  ;;  %v124_v12 = vld [vmem:[#allocation10 + $0x10] sm:$0xff]  ;;  %v122_v37 = vld [vmem:[#allocation10] sm:$0xff] }
  0x1f   :  { %v142_v10 = vsel %vm140_vm0, %v136_v7, 0  ;;  %v123_v13 = vld [vmem:[#allocation10 + $0x8] sm:$0xff]  ;;  %157 = vmatpush.msra.mxu0 %v1153_v3  ;;  %v186_v14 = vsub.f32 %v134_v0, %v1153_v3  ;;  %257 = vmatpush.msra.mxu3 %v1153_v3  ;;  %v192_v15 = vsub.f32 %v133_v1, %v1155_v4  ;;  %v1179_v20 = vand.u32 4294901760, %v124_v12  ;;  %v329_v38 = vld [vmem:[#allocation5] sm:$0xff]  ;;  %s1077_s23 = smov [#allocation14]   ;;  %s780_s1 = sshll.u32 %s1267_s9, 4  ;;  %s781_s1 = int_to_ptr.hbm [resolvable:$true] %s780_s1 }
  0x20   :  { %v1169_v16 = vsub.f32 %v132_v2, %v1157_v5  ;;  %v1171_v17 = vand.u32 4294901760, %v142_v10  ;;  %v1174_v18 = vsub.f32 %v131_v6, %v1159_v9  ;;  %v1177_v19 = vsub.f32 %v125_v8, %v1162_v11  ;;  %v828_v63 = vld [vmem:[%s1263_s5] ss:$0 sm:$0xff]  ;;  %s1074_s5 = smov 32   ;;  %s778_s24 = sshll.u32 %s1077_s23, 4  ;;  %s779_s24 = int_to_ptr.vmem [resolvable:$true] %s778_s24 }
  0x21   :  { %v1181_v21 = vand.u32 4294901760, %v123_v13  ;;  %228 = vmatpush.msra.mxu2 %v186_v14  ;;  %159 = vmatpush.msra.mxu0 %v1155_v4  ;;  %v187_v22 = vand.u32 4294901760, %v186_v14  ;;  %v193_v23 = vand.u32 4294901760, %v192_v15  ;;  %v1190_v28 = vsub.f32 %v124_v12, %v1179_v20  ;;  %s1078_s27 = smov [#allocation16]   ;;  %s791_s3 = sshll.u32 %s1268_s10, 4  ;;  %s792_s3 = int_to_ptr.hbm [resolvable:$true] %s791_s3 }
  0x22   :  { %v165_v24 = vsub.f32 %v142_v10, %v1171_v17  ;;  %v199_v25 = vand.u32 4294901760, %v1169_v16  ;;  %259 = vmatpush.msra.mxu3 %v1155_v4  ;;  %v377_v26 = vand.u32 4294901760, %v1177_v19  ;;  %v205_v27 = vand.u32 4294901760, %v1174_v18  ;;  %s789_s28 = sshll.u32 %s1078_s27, 4  ;;  %s1079_s9 = smov [#allocation13]   ;;  %s790_s28 = int_to_ptr.vmem [resolvable:$true] %s789_s28 }
  0x23   :  { %v1193_v29 = vsub.f32 %v123_v13, %v1181_v21  ;;  %231 = vmatpush.msra.mxu2 %v192_v15  ;;  %161 = vmatpush.msra.mxu0 %v1157_v5  ;;  %v188_v30 = vsub.f32 %v186_v14, %v187_v22  ;;  %v194_v31 = vsub.f32 %v192_v15, %v193_v23  ;;  %v383_v35 = vand.u32 4294901760, %v1190_v28  ;;  %s767_s13 = sshll.u32 %s1079_s9, 4  ;;  %s769_s15 = sshll.u32 %s1266_s8, 4  ;;  %s768_s13 = int_to_ptr.vmem [resolvable:$true] %s767_s13  ;;  %s770_s15 = int_to_ptr.hbm [resolvable:$true] %s769_s15 }
  0x24   :  { %v166_v32 = vand.u32 4294901760, %v165_v24  ;;  %v200_v33 = vsub.f32 %v1169_v16, %v199_v25  ;;  %261 = vmatpush.msra.mxu3 %v1157_v5  ;;  %v378_v34 = vsub.f32 %v1177_v19, %v377_v26  ;;  %v206_v42 = vsub.f32 %v1174_v18, %v205_v27 }
  0x25   :  { %v389_v36 = vand.u32 4294901760, %v1193_v29  ;;  %v189_v39 = vand.u32 4294901760, %v188_v30  ;;  %234 = vmatpush.msra.mxu2 %v1169_v16  ;;  %163 = vmatpush.msra.mxu0 %v1159_v9  ;;  %v195_v40 = vand.u32 4294901760, %v194_v31  ;;  %v384_v45 = vsub.f32 %v1190_v28, %v383_v35 }
  0x26   :  { %v167_v41 = vsub.f32 %v165_v24, %v166_v32  ;;  %263 = vmatpush.msra.mxu3 %v1159_v9  ;;  %v201_v43 = vand.u32 4294901760, %v200_v33  ;;  %v379_v44 = vand.u32 4294901760, %v378_v34  ;;  %v352_v48 = vand.u32 4294901760, %v122_v37 }
  0x27   :  { %286 = vmatpush.msrb.mxu0 %v187_v22  ;;  %190 = vmatpush.msra.mxu1 %v189_v39  ;;  %v390_v47 = vsub.f32 %v1193_v29, %v389_v36  ;;  %v332_v49 = vsel %vm140_vm0, %v329_v38, 0  ;;  %v385_v50 = vand.u32 4294901760, %v384_v45  ;;  %v207_v52 = vand.u32 4294901760, %v206_v42  ;;  %v129_v45 = vld [vmem:[#allocation11 + $0x18] sm:$0xff] }
  0x28   :  { %237 = vmatpush.msra.mxu2 %v1174_v18  ;;  %v168_v46 = vand.u32 4294901760, %v167_v41  ;;  %267 = vmatmul.f32.vlgmr.msra.gmra.mxu3 %v166_v32  ;;  %v354_v51 = vand.u32 4294901760, %v332_v49  ;;  %v394_v53 = vsub.f32 %v122_v37, %v352_v48 }
  0x29   :  { %240 = vmatmul.f32.vlgmr.msra.gmra.mxu2 %v165_v24  ;;  %196 = vmatpush.msra.mxu1 %v195_v40  ;;  %v391_v55 = vand.u32 4294901760, %v390_v47  ;;  %v330_v24 = vld [vmem:[#allocation7] sm:$0xff]  ;;  %v581_v47 = vand.u32 4294901760, %v129_v45 }
  0x2a   :  { %169 = vmatmul.f32.vlgmr.msra.gmra.mxu0 %v168_v46  ;;  %347 = vmatpush.msrb.mxu2 %v1162_v11  ;;  %v355_v54 = vsub.f32 %v332_v49, %v354_v51  ;;  %v395_v56 = vand.u32 4294901760, %v394_v53  ;;  %v128_v46 = vld [vmem:[#allocation11 + $0x10] sm:$0xff] }
  0x2b   :  { %380 = vmatpush.msrb.mxu3 %v379_v44  ;;  %202 = vmatpush.msra.mxu1 %v201_v43  ;;  %v611_v49 = vsub.f32 %v129_v45, %v581_v47 }
  0x2c   :  { %290 = vmatpush.msrb.mxu0 %v193_v23  ;;  %349 = vmatpush.msrb.mxu2 %v1179_v20  ;;  %v356_v57 = vand.u32 4294901760, %v355_v54  ;;  %v396_v58 = vsub.f32 %v394_v53, %v395_v56 }
  0x2d   :  { %386 = vmatpush.msrb.mxu3 %v385_v50  ;;  %208 = vmatpush.msra.mxu1 %v207_v52 }
  0x2e   :  { %294 = vmatpush.msrb.mxu0 %v199_v25  ;;  %210 = vmatmul.f32.vlgmr.msra.gmra.mxu1 %v1171_v17  ;;  %v357_v59 = vsub.f32 %v355_v54, %v356_v57  ;;  %v397_v60 = vand.u32 4294901760, %v396_v58 }
  0x2f   :  { %351 = vmatpush.msrb.mxu2 %v1181_v21  ;;  %317 = vmatpush.msrb.mxu1 %v1153_v3 }
  0x30   :  { %392 = vmatpush.msrb.mxu3 %v391_v55  ;;  %298 = vmatpush.msrb.mxu0 %v205_v27  ;;  %v358_v61 = vand.u32 4294901760, %v357_v59  ;;  %v127_v59 = vld [vmem:[#allocation11 + $0x8] sm:$0xff] }
  0x31   :  { %353 = vmatpush.msrb.mxu2 %v352_v48  ;;  %319 = vmatpush.msrb.mxu1 %v1155_v4 }
  0x32   :  { %398 = vmatpush.msrb.mxu3 %v397_v60  ;;  %300 = vmatmul.f32.vlgmr.msrb.gmra.mxu0 %v1171_v17  ;;  %v585_v60 = vand.u32 4294901760, %v127_v59 }
  0x33   :  { %359 = vmatmul.f32.vlgmr.msrb.gmra.mxu2 %v358_v61  ;;  %321 = vmatpush.msrb.mxu1 %v1157_v5  ;;  %v126_v61 = vld [vmem:[#allocation11] sm:$0xff] }
  0x34   :  { %400 = vmatmul.f32.vlgmr.msrb.gmra.mxu3 %v354_v51  ;;  %476 = vmatpush.msra.mxu2 %v377_v26 }
  0x35   :  { %418 = vmatpush.msra.mxu0 %v1177_v19  ;;  %323 = vmatpush.msrb.mxu1 %v1159_v9 }
  0x36   :  { %507 = vmatpush.msra.mxu3 %v1162_v11  ;;  %480 = vmatpush.msra.mxu2 %v383_v35 }
  0x37   :  { %421 = vmatpush.msra.mxu0 %v1190_v28  ;;  %325 = vmatmul.f32.vlgmr.msrb.gmra.mxu1 %v1171_v17 }
  0x38   :  { %509 = vmatpush.msra.mxu3 %v1179_v20  ;;  %447 = vmatpush.msra.mxu1 %v1162_v11 }
  0x39   :  { %484 = vmatpush.msra.mxu2 %v389_v36  ;;  %424 = vmatpush.msra.mxu0 %v1193_v29 }
  0x3a   :  { %511 = vmatpush.msra.mxu3 %v1181_v21  ;;  %449 = vmatpush.msra.mxu1 %v1179_v20 }
  0x3b   :  { %488 = vmatpush.msra.mxu2 %v395_v56  ;;  %427 = vmatpush.msra.mxu0 %v394_v53 }
  0x3c   :  { %490 = vmatmul.f32.vlgmr.msra.gmra.mxu2 %v354_v51  ;;  %430 = vmatmul.f32.vlgmr.msra.gmra.mxu0 %v355_v54 }
  0x3d   :  { %451 = vmatpush.msra.mxu1 %v1181_v21  ;;  %513 = vmatpush.msra.mxu3 %v352_v48 }
  0x3e   :  { %515 = vmatmul.f32.vlgmr.msra.gmra.mxu3 %v354_v51  ;;  %582 = vmatpush.msrb.mxu0 %v581_v47  ;;  %v612_v51 = vand.u32 4294901760, %v611_v49 }
  0x3f   :  { %453 = vmatpush.msra.mxu1 %v352_v48  ;;  %v583_v48 = vand.u32 4294901760, %v128_v46  ;;  %682 = vmatpush.msrb.mxu3 %v581_v47 }
  0x40   :  { %457 = vmatmul.f32.vlgmr.msra.gmra.mxu1 %v356_v57  ;;  %653 = vmatpush.msrb.mxu2 %v611_v49  ;;  %v613_v53 = vsub.f32 %v611_v49, %v612_v51 }
  0x41   :  { %v617_v50 = vsub.f32 %v128_v46, %v583_v48  ;;  %684 = vmatpush.msrb.mxu3 %v583_v48  ;;  %584 = vmatpush.msrb.mxu0 %v583_v48 }
  0x42   :  { %v614_v55 = vand.u32 4294901760, %v613_v53 }
  0x43   :  { %v618_v52 = vand.u32 4294901760, %v617_v50  ;;  %656 = vmatpush.msrb.mxu2 %v617_v50  ;;  %686 = vmatpush.msrb.mxu3 %v585_v60 }
  0x44   :  { %615 = vmatpush.msrb.mxu1 %v614_v55  ;;  %586 = vmatpush.msrb.mxu0 %v585_v60 }
  0x45   :  { %v619_v54 = vsub.f32 %v617_v50, %v618_v52 }
  0x47   :  { %v620_v56 = vand.u32 4294901760, %v619_v54 }
  0x49   :  { %621 = vmatpush.msrb.mxu1 %v620_v56 }
  0xa7   :  { %v170_v62 = vpop.f32.mrf.mxu0 }
  0xa8   :  { %v171_v3 = vadd.f32 %v828_v63, %v170_v62  ;;  %v623_v62 = vsub.f32 %v127_v59, %v585_v60  ;;  %v587_v63 = vand.u32 4294901760, %v126_v61 }
  0xaa   :  { %659 = vmatpush.msrb.mxu2 %v623_v62  ;;  %688 = vmatpush.msrb.mxu3 %v587_v63 }
  0xab   :  { %v211_v0 = vpop.f32.mrf.mxu1  ;;  %v268_v2 = vpop.f32.mrf.mxu3  ;;  %588 = vmatpush.msrb.mxu0 %v587_v63 }
  0xac   :  { %v241_v1 = vpop.f32.mrf.mxu2  ;;  %v212_v5 = vadd.f32 %v211_v0, %v171_v3  ;;  %v624_v0 = vand.u32 4294901760, %v623_v62 }
  0xad   :  { %711 = vmatpush.msra.mxu0 %v612_v51 }
  0xae   :  { %v242_v8 = vadd.f32 %v241_v1, %v212_v5  ;;  %v629_v1 = vsub.f32 %v126_v61, %v587_v63 }
  0xaf   :  { %v301_v4 = vpop.f32.mrf.mxu0  ;;  %715 = vmatpush.msra.mxu0 %v618_v52 }
  0xb0   :  { %v269_v12 = vadd.f32 %v268_v2, %v242_v8  ;;  %v625_v2 = vsub.f32 %v623_v62, %v624_v0  ;;  %v630_v3 = vand.u32 4294901760, %v629_v1  ;;  %662 = vmatpush.msrb.mxu2 %v629_v1 }
  0xb1   :  { %719 = vmatpush.msra.mxu0 %v624_v0 }
  0xb2   :  { %v302_v16 = vadd.f32 %v301_v4, %v269_v12  ;;  %v626_v4 = vand.u32 4294901760, %v625_v2  ;;  %v631_v5 = vsub.f32 %v629_v1, %v630_v3 }
  0xb3   :  { %723 = vmatpush.msra.mxu0 %v630_v3 }
  0xb4   :  { %v326_v6 = vpop.f32.mrf.mxu1  ;;  %627 = vmatpush.msrb.mxu1 %v626_v4 }
  0xb5   :  { %v327_v20 = vadd.f32 %v326_v6, %v302_v16  ;;  %v632_v6 = vand.u32 4294901760, %v631_v5 }
  0xb6   :  { %v360_v7 = vpop.f32.mrf.mxu2 }
  0xb7   :  { %v401_v9 = vpop.f32.mrf.mxu3  ;;  %633 = vmatpush.msrb.mxu1 %v632_v6 }
  0xb8   :  { %v402_v10 = vadd.f32 %v401_v9, %v360_v7 }
  0xb9   :  { %v431_v11 = vpop.f32.mrf.mxu0  ;;  %742 = vmatpush.msra.mxu1 %v581_v47 }
  0xba   :  { %v432_v13 = vadd.f32 %v431_v11, %v402_v10 }
  0xbb   :  { %744 = vmatpush.msra.mxu1 %v583_v48 }
  0xbd   :  { %v458_v14 = vpop.f32.mrf.mxu1  ;;  %746 = vmatpush.msra.mxu1 %v585_v60 }
  0xbe   :  { %v459_v15 = vadd.f32 %v458_v14, %v432_v13 }
  0xbf   :  { %v491_v17 = vpop.f32.mrf.mxu2  ;;  %748 = vmatpush.msra.mxu1 %v587_v63 }
  0xc0   :  { %v492_v18 = vadd.f32 %v491_v17, %v459_v15  ;;  %v829_v15 = vld [vmem:[%s1265_s7] ss:$0 sm:$0xff] }
  0xc1   :  { %v516_v19 = vpop.f32.mrf.mxu3 }
  0xc2   :  { %v517_v21 = vadd.f32 %v516_v19, %v492_v18 }
  0xc4   :  { %v519_v22 = vadd.f32 %v517_v21, %v327_v20 }
  0xc6   :  { %830 = vtanh.f32 %v519_v22  ;;  %v813_v25 = vmul.f32 -1.442695, %v519_v22 }
  0xc8   :  { %832 = vpow2.f32 %v813_v25 }
  0xcc   :  { %v831_v23 = vpop.eup %830 }
  0xcd   :  { %546 = vrot.lane.b32.xlu0 %v831_v23, %s1074_s5 }
  0xce   :  { %v833_v26 = vpop.eup %832 }
  0xcf   :  { %v523_v27 = vadd.f32 1.0, %v833_v26 }
  0xd1   :  { %834 = vrcp.f32 %v523_v27  ;;  %v535_v33 = vand.u32 2147483648, %v523_v27  ;;  %vm529_vm2 = vweird.f32 %v523_v27  ;;  %v533_v34 = vand.u32 2147483647, %v523_v27 }
  0xd3   :  { %v536_v36 = vor.u32 1.1754944e-38, %v535_v33  ;;  %vm534_vm4 = vcmp.eq.f32.partialorder %v533_v34, 8.507059e+37 }
  0xd5   :  { %541 = vrot.lane.b32.xlu0 %v330_v24, %s1074_s5 }
  0xd7   :  { %v835_v28 = vpop.eup %834 }
  0xd8   :  { %v525_v29 = vmul.f32 %v835_v28, %v523_v27  ;;  %vm530_vm1 = vweird.f32 %v835_v28 }
  0xd9   :  { %vm531_vm3 = vmor %vm529_vm2, %vm530_vm1 }
  0xda   :  { %v526_v30 = vsub.f32 1.0, %v525_v29 }
  0xdc   :  { %v527_v31 = vmul.f32 %v835_v28, %v526_v30 }
  0xde   :  { %v528_v32 = vadd.f32 %v835_v28, %v527_v31 }
  0xe0   :  { %v532_v35 = vsel %vm531_vm3, %v835_v28, %v528_v32 }
  0xe1   :  { %v537_v38 = vsel %vm534_vm4, %v536_v36, %v532_v35 }
 0x13f   :  { %v547_v37 = vpop.permute.xlu0 %546 }
 0x140   :  { %v549_v39 = vmul.f32 %v547_v37, %v537_v38 }
 0x142   :  { %551 = vrot.lane.b32.xlu1 %v549_v39, %s1074_s5 }
 0x147   :  { %v542_v40 = vpop.permute.xlu0 %541 }
 0x148   :  { %v544_v41 = vmul.f32 %v542_v40, %v537_v38 }
 0x1b4   :  { %v552_v42 = vpop.permute.xlu1 %551 }
 0x1b5   :  { %v554_v43 = vadd.f32 %v552_v42, %v544_v41 }
 0x1b7   :  { %836 = vtanh.f32 %v554_v43 }
 0x1bd   :  { %v837_v44 = vpop.eup %836 }
 0x1be   :  { %557 = vrot.lane.b32.xlu1 %v837_v44, %s1074_s5 }
 0x230   :  { %v558_v57 = vpop.permute.xlu1 %557 }
 0x231   :  { %v560_v58 = vmul.f32 %v558_v57, %v537_v38 }
 0x233   :  { %565 = vrot.lane.b32.xlu2 %v560_v58, %s1075_s21 }
 0x23b   :  { %758 = vrot.lane.b32.xlu2 %v554_v43, %s1076_s22 }
 0x28d   :  { %v566_v7 = vpop.permute.xlu2 %565 }
 0x28e   :  { %v567_v8 = vsel %vm140_vm0, %v566_v7, 0  ;;  %756 = vst.msk [vmem:[#allocation14] sm:$0xff] %vm140_vm0, %v566_v7 }
 0x28f   :  { %v589_v9 = vand.u32 4294901760, %v567_v8  ;;  %783 = dma.vmem_to_hbm [thread:$0]  %s779_s24, 128, %s781_s1, [#allocation15]  }
 0x291   :  { %v590_v10 = vsub.f32 %v567_v8, %v589_v9  ;;  %635 = vmatmul.f32.vlgmr.msrb.gmra.mxu1 %v589_v9 }
 0x293   :  { %v591_v11 = vand.u32 4294901760, %v590_v10  ;;  %665 = vmatmul.f32.vlgmr.msrb.gmra.mxu2 %v590_v10 }
 0x295   :  { %v592_v12 = vsub.f32 %v590_v10, %v591_v11  ;;  %692 = vmatmul.f32.vlgmr.msrb.gmra.mxu3 %v591_v11  ;;  %v759_v13 = vpop.permute.xlu2 %758 }
 0x296   :  { %761 = vst.msk [vmem:[#allocation16] sm:$0xff] %vm140_vm0, %v759_v13 }
 0x297   :  { %v593_v14 = vand.u32 4294901760, %v592_v12  ;;  %794 = dma.vmem_to_hbm [thread:$0]  %s790_s28, 128, %s792_s3, [#allocation15]  }
 0x299   :  { %594 = vmatmul.f32.vlgmr.msrb.gmra.mxu0 %v593_v14  ;;  %750 = vmatmul.f32.vlgmr.msra.gmra.mxu1 %v589_v9 }
 0x2a1   :  { %725 = vmatmul.f32.vlgmr.msra.gmra.mxu0 %v589_v9 }
 0x30e   :  { %v636_v16 = vpop.f32.mrf.mxu1 }
 0x316   :  { %v595_v17 = vpop.f32.mrf.mxu0  ;;  %v666_v20 = vpop.f32.mrf.mxu2 }
 0x317   :  { %v596_v18 = vadd.f32 %v829_v15, %v595_v17  ;;  %v751_v26 = vpop.f32.mrf.mxu1 }
 0x318   :  { %v693_v22 = vpop.f32.mrf.mxu3 }
 0x319   :  { %v637_v19 = vadd.f32 %v636_v16, %v596_v18 }
 0x31b   :  { %v667_v21 = vadd.f32 %v666_v20, %v637_v19 }
 0x31d   :  { %v694_v23 = vadd.f32 %v693_v22, %v667_v21 }
 0x31e   :  { %v726_v24 = vpop.f32.mrf.mxu0 }
 0x31f   :  { %v727_v25 = vadd.f32 %v726_v24, %v694_v23 }
 0x321   :  { %v752_v27 = vadd.f32 %v751_v26, %v727_v25 }
 0x323   :  { %754 = vst [vmem:[#allocation13] sm:$0xff] %v752_v27 }
 0x324   :  { %772 = dma.vmem_to_hbm [thread:$0]  %s768_s13, 128, %s770_s15, [#allocation4]  }
 0x325   :  { %1062 = dma.done.wait [#allocation4], 128  }
 0x326   :  { %1063 = vsyncadd [#allocation4], 4294967168 }
 0x327   :  { %1064 = dma.done.wait [#allocation15], 256  }
 0x328   :  { %1065 = vsyncadd [#allocation15], 4294967040 }
 0x329   :  { %807 = vsyncpa [#allocation3], 1 }
 0x32a   :  { %808 = vsyncpa [#allocation6], 1 }
 0x32b   :  { %809 = vsyncpa [#allocation9], 1 }
 0x32c   :  { %810 = vsyncpa [#allocation12], 1 }
 0x32d   :  { %811 = vsyncpa [#allocation4], 1 }
 0x32e   :  { %812 = vsyncpa [#allocation15], 1 }

</bundles_post_ra>
